<compile_context>
chip_gen: v7x
topology: tpu7x:2x2x1
jax: 0.10.0
libtpu: 0.0.40
codegen_flags: <defaults>
</compile_context>

<pallas_src>
import jax
import jax.numpy as jnp
from jax.experimental import pallas as pl
from jax.experimental.pallas import tpu as pltpu


def _round_up(x: int, m: int) -> int:
    return ((x + m - 1) // m) * m


def _choose_tile(dim: int, align: int, max_tile: int) -> int:
    """Largest multiple of `align` that divides round_up(dim, align), <= max_tile."""
    padded = _round_up(dim, align)
    best = align
    t = align
    cap = min(max_tile, padded)
    while t <= cap:
        if padded % t == 0:
            best = t
        t += align
    return best


def linear_kernel(x_ref, w_ref, b_ref, o_ref):
    """One (tm, tn) logits tile, streaming over the K (xdim) axis.

    o_ref's index_map ignores the K grid index, so the f32 output block stays
    resident in VMEM across the whole reduction: accumulate directly into it
    (no scratch accumulator, no epilogue copy).
    """
    k = pl.program_id(2)

    @pl.when(k == 0)
    def _init():
        o_ref[...] = jnp.zeros_like(o_ref)

    # bf16 x bf16 -> f32 accumulate on the MXU. Weight was pre-transposed to
    # (K, Y) once at init, so there is no in-kernel transpose.
    o_ref[...] += jnp.dot(x_ref[...], w_ref[...],
                          preferred_element_type=jnp.float32)

    @pl.when(k == pl.num_programs(2) - 1)
    def _finalize():
        # Bias added once, in the epilogue only (inner loop stays pure MXU).
        o_ref[...] += b_ref[...]


class SoftmaxClassPallas:
    """Pallas equivalent of SoftmaxClass.forward: logits = x @ W.T + b.

    (The PyTorch module returns raw logits; softmax is applied by the loss.)
    Weight preparation (transpose -> (K, Y), zero-pad, cast to bf16) happens
    exactly once here, not on every forward call.
    """

    def __init__(self, weight, bias, *, tm=512, tn=512, tk=1024):
        ydim, xdim = weight.shape
        self.xdim, self.ydim = xdim, ydim
        self.tm_max = tm

        # Tiles that exactly divide the (128-aligned) padded dims -> no wasted
        # MXU work / DMA bytes on Y padding beyond the minimum 128 alignment.
        self.tk = _choose_tile(xdim, 128, tk)
        self.tn = _choose_tile(ydim, 128, tn)
        self.k_pad = _round_up(xdim, self.tk)
        self.y_pad = _round_up(ydim, self.tn)

        # One-time weight prep: transpose to (K, Y), pad, cast to bf16.
        w_t = jnp.asarray(weight, jnp.float32).T                       # (K, Y)
        w_t = jnp.pad(w_t, ((0, self.k_pad - xdim), (0, self.y_pad - ydim)))
        self.w_prepped = w_t.astype(jnp.bfloat16)                      # (k_pad, y_pad)

        b = jnp.asarray(bias, jnp.float32).reshape(1, ydim)
        self.b_prepped = jnp.pad(b, ((0, 0), (0, self.y_pad - ydim)))  # f32 (1, y_pad)

    def __call__(self, x):
        n = x.shape[0]
        tm = _choose_tile(n, 8, self.tm_max)
        n_pad = _round_up(n, tm)
        tn, tk = self.tn, self.tk
        k_pad, y_pad = self.k_pad, self.y_pad

        # v7x has 2 TensorCores: if both "parallel" axes collapsed to a single
        # block, split the j axis (when Y allows) so both cores get work.
        if n_pad // tm == 1 and y_pad // tn == 1:
            for cand in range(tn - 128, 0, -128):
                if y_pad % cand == 0:
                    tn = cand
                    break

        # Activations: cast to bf16; only materialize a padded copy if a pad
        # is actually needed (K padding is required for correctness, N padding
        # only to fill the last tile).
        x_p = jnp.asarray(x, jnp.float32).astype(jnp.bfloat16)
        if n_pad != n or k_pad != self.xdim:
            x_p = jnp.pad(x_p, ((0, n_pad - n), (0, k_pad - self.xdim)))

        grid = (n_pad // tm, y_pad // tn, k_pad // tk)

        # VMEM budget: double-buffered bf16 x/w tiles + bias + resident f32 out.
        vmem_bytes = 2 * (tm * tk * 2 + tk * tn * 2 + tn * 4 + tm * tn * 4)
        vmem_limit = int(min(max(2 * vmem_bytes, 16 * 1024 * 1024),
                             48 * 1024 * 1024))

        cost = pl.CostEstimate(
            flops=2 * n_pad * k_pad * y_pad,
            transcendentals=0,
            bytes_accessed=(n_pad * k_pad * 2 + k_pad * y_pad * 2
                            + n_pad * y_pad * 4),
        )

        out_padded = pl.pallas_call(
            linear_kernel,
            out_shape=jax.ShapeDtypeStruct((n_pad, y_pad), jnp.float32),
            grid=grid,
            in_specs=[
                pl.BlockSpec((tm, tk), lambda i, j, kk: (i, kk)),   # x tile
                pl.BlockSpec((tk, tn), lambda i, j, kk: (kk, j)),   # W^T tile
                pl.BlockSpec((1, tn), lambda i, j, kk: (0, j)),     # bias tile
            ],
            out_specs=pl.BlockSpec((tm, tn), lambda i, j, kk: (i, j)),
            compiler_params=pltpu.CompilerParams(
                dimension_semantics=("parallel", "parallel", "arbitrary"),
                vmem_limit_bytes=vmem_limit),
            cost_estimate=cost,
        )(x_p, self.w_prepped, self.b_prepped)

        return out_padded[:n, :self.ydim]


if __name__ == "__main__":
    # ---- Toy problem from the reference script (5x4 -> 5x3) --------------
    x_data = [[5.1, 3.5, 1.4, 0.2],
              [4.9, 3.0, 1.4, 0.2],
              [5.8, 2.6, 4.0, 1.2],
              [6.7, 9.0, 5.2, 2.3],
              [5.6, 2.8, 4.9, 2.0]]
    y_data = [2, 2, 1, 0, 0]

    x_train = jnp.asarray(x_data, dtype=jnp.float32)      # (5, 4)
    xdim = x_train.shape[1]                                # 4
    ydim = len(set(y_data))                                # 3

    # Deterministic init mimicking nn.Linear's uniform(-1/sqrt(xdim), 1/sqrt(xdim)).
    key = jax.random.PRNGKey(0)
    k_w, k_b = jax.random.split(key)
    bound = 1.0 / (xdim ** 0.5)
    weight = jax.random.uniform(k_w, (ydim, xdim), jnp.float32, -bound, bound)
    bias = jax.random.uniform(k_b, (ydim,), jnp.float32, -bound, bound)

    model = SoftmaxClassPallas(weight, bias)
    out = model(x_train)
    jax.block_until_ready(out)

    # Reference with the same bf16 operand rounding (f32 accumulate).
    def ref_fn(x, w, b):
        xw = x.astype(jnp.bfloat16).astype(jnp.float32)
        ww = w.astype(jnp.bfloat16).astype(jnp.float32)
        return xw @ ww.T + b

    ref = ref_fn(x_train, weight, bias)
    assert out.shape == (x_train.shape[0], ydim)
    assert jnp.allclose(out, ref, atol=1e-2, rtol=1e-2), float(jnp.abs(out - ref).max())

    # ---- Larger case: multi-tile grid, non-pow2 Y (384), zero pad waste ---
    k2a, k2b, k2c = jax.random.split(jax.random.PRNGKey(1), 3)
    n2, xd2, yd2 = 64, 256, 384
    x2 = jax.random.normal(k2a, (n2, xd2), jnp.float32)
    w2 = jax.random.normal(k2b, (yd2, xd2), jnp.float32) * 0.05
    b2 = jax.random.normal(k2c, (yd2,), jnp.float32)
    model2 = SoftmaxClassPallas(w2, b2)
    out2 = model2(x2)
    jax.block_until_ready(out2)
    ref2 = ref_fn(x2, w2, b2)
    assert out2.shape == (n2, yd2)
    assert jnp.allclose(out2, ref2, atol=3e-2, rtol=3e-2), float(jnp.abs(out2 - ref2).max())

    print("KERNEL_OK")
</pallas_src>

<mosaic_0001>
module attributes {stable_mosaic.version = 11 : i64} {
  func.func @linear_kernel(%arg0: i32, %arg1: i32, %arg2: i32, %arg3: memref<8x128xbf16, #tpu.memory_space<vmem>>, %arg4: memref<128x128xbf16, #tpu.memory_space<vmem>>, %arg5: memref<1x128xf32, #tpu.memory_space<vmem>>, %arg6: memref<8x128xf32, #tpu.memory_space<vmem>>) attributes {dimension_semantics = [#tpu.dimension_semantics<parallel>, #tpu.dimension_semantics<parallel>, #tpu.dimension_semantics<arbitrary>], iteration_bounds = array<i64: 1, 1, 1>, scalar_prefetch = 0 : i64, scratch_operands = 0 : i64, tpu.core_type = #tpu.core_type<tc>, window_params = [{transform_indices = @transform_0, window_bounds = array<i64: 8, 128>}, {transform_indices = @transform_1, window_bounds = array<i64: 128, 128>}, {transform_indices = @transform_2, window_bounds = array<i64: 1, 128>}, {transform_indices = @transform_3, window_bounds = array<i64: 8, 128>}]} {
    %c0_i32 = arith.constant 0 : i32
    %0 = arith.cmpi eq, %arg2, %c0_i32 : i32
    %1 = arith.extui %0 : i1 to i32
    %c0_i32_0 = arith.constant 0 : i32
    %2 = arith.cmpi ne, %1, %c0_i32_0 : i32
    scf.if %2 {
      %cst_10 = arith.constant 0.000000e+00 : f32
      %12 = vector.broadcast %cst_10 : f32 to vector<8x128xf32>
      %c0_11 = arith.constant 0 : index
      %c0_12 = arith.constant 0 : index
      %13 = vector.load %arg6[%c0_11, %c0_12] : memref<8x128xf32, #tpu.memory_space<vmem>>, vector<8x128xf32>
      tpu.vector_store %arg6[%c0_11, %c0_12], %12 {strides = array<i32>} : memref<8x128xf32, #tpu.memory_space<vmem>>, vector<8x128xf32>,
    } else {
    }
    %c0 = arith.constant 0 : index
    %c0_1 = arith.constant 0 : index
    %3 = vector.load %arg6[%c0, %c0_1] : memref<8x128xf32, #tpu.memory_space<vmem>>, vector<8x128xf32>
    %c0_2 = arith.constant 0 : index
    %c0_3 = arith.constant 0 : index
    %4 = vector.load %arg3[%c0_2, %c0_3] : memref<8x128xbf16, #tpu.memory_space<vmem>>, vector<8x128xbf16>
    %c0_4 = arith.constant 0 : index
    %c0_5 = arith.constant 0 : index
    %5 = vector.load %arg4[%c0_4, %c0_5] : memref<128x128xbf16, #tpu.memory_space<vmem>>, vector<128x128xbf16>
    %cst = arith.constant dense<0.000000e+00> : vector<8x128xf32>
    %6 = tpu.matmul %4, %5, %cst {dimension_numbers = #tpu.dot_dimension_numbers<[1], [0], [0], [1], [0, 0, 1, 1], [], []>} : vector<8x128xbf16>, vector<128x128xbf16>, vector<8x128xf32> -> vector<8x128xf32>
    %7 = arith.addf %3, %6 : vector<8x128xf32>
    %c0_6 = arith.constant 0 : index
    %c0_7 = arith.constant 0 : index
    %8 = vector.load %arg6[%c0_6, %c0_7] : memref<8x128xf32, #tpu.memory_space<vmem>>, vector<8x128xf32>
    tpu.vector_store %arg6[%c0_6, %c0_7], %7 {strides = array<i32>} : memref<8x128xf32, #tpu.memory_space<vmem>>, vector<8x128xf32>,
    %c0_i32_8 = arith.constant 0 : i32
    %9 = arith.cmpi eq, %arg2, %c0_i32_8 : i32
    %10 = arith.extui %9 : i1 to i32
    %c0_i32_9 = arith.constant 0 : i32
    %11 = arith.cmpi ne, %10, %c0_i32_9 : i32
    scf.if %11 {
      %c0_10 = arith.constant 0 : index
      %c0_11 = arith.constant 0 : index
      %12 = vector.load %arg6[%c0_10, %c0_11] : memref<8x128xf32, #tpu.memory_space<vmem>>, vector<8x128xf32>
      %c0_12 = arith.constant 0 : index
      %c0_13 = arith.constant 0 : index
      %13 = vector.load %arg5[%c0_12, %c0_13] : memref<1x128xf32, #tpu.memory_space<vmem>>, vector<1x128xf32>
      %14 = vector.broadcast %13 : vector<1x128xf32> to vector<8x128xf32>
      %15 = arith.addf %12, %14 : vector<8x128xf32>
      %c0_14 = arith.constant 0 : index
      %c0_15 = arith.constant 0 : index
      %16 = vector.load %arg6[%c0_14, %c0_15] : memref<8x128xf32, #tpu.memory_space<vmem>>, vector<8x128xf32>
      tpu.vector_store %arg6[%c0_14, %c0_15], %15 {strides = array<i32>} : memref<8x128xf32, #tpu.memory_space<vmem>>, vector<8x128xf32>,
    } else {
    }
    return
  }
  func.func @transform_0(%arg0: i32, %arg1: i32, %arg2: i32) -> (i32, i32) {
    %c0_i32 = arith.constant 0 : i32
    return %arg0, %arg2 : i32, i32
  }
  func.func @transform_1(%arg0: i32, %arg1: i32, %arg2: i32) -> (i32, i32) {
    %c0_i32 = arith.constant 0 : i32
    return %arg2, %arg1 : i32, i32
  }
  func.func @transform_2(%arg0: i32, %arg1: i32, %arg2: i32) -> (i32, i32) {
    %c0_i32 = arith.constant 0 : i32
    %c0_i32_0 = arith.constant 0 : i32
    return %c0_i32, %arg1 : i32, i32
  }
  func.func @transform_3(%arg0: i32, %arg1: i32, %arg2: i32) -> (i32, i32) {
    %c0_i32 = arith.constant 0 : i32
    return %arg0, %arg1 : i32, i32
  }
}

</mosaic_0001>

<bundles_post_ra>
// kernel: tpu_custom_call.1
= control target key start
LH: loop header
LB: loop body
LE: loop exit
PB: predicated region body
PF: predicated region fallthrough
CT: control target
= control target key end

     0   :  { %8 = vsyncpa [#allocation3], 0  ;;  %s382_s0 = inlined_call_operand.hbm [shape: bf16[8,128], index: 0, kind: input, shape index: {}]   ;;  %s383_s1 = inlined_call_operand.hbm [shape: bf16[128,128], index: 1, kind: input, shape index: {}]   ;;  %s384_s2 = inlined_call_operand.vmem [shape: f32[1,128], index: 2, kind: input, shape index: {}]   ;;  %s385_s3 = inlined_call_operand.hbm [shape: f32[8,128], index: 3, kind: output, shape index: {}]  }
   0x1   :  { %9 = vsyncpa [#allocation6], 0 }
   0x2   :  { %10 = vsyncpa [#allocation4], 0  ;;  %s309_s12 = smov [#allocation2]   ;;  %s310_s14 = smov [#allocation5]  }
   0x3   :  { %s17_s13 = sshll.u32 %s309_s12, 4  ;;  %s26_s15 = sshll.u32 %s310_s14, 4  ;;  %s18_s13 = int_to_ptr.vmem [resolvable:$true] %s17_s13  ;;  %s336_s15 = int_to_ptr.vmem [resolvable:$true] %s26_s15 }
   0x4   :  { %s237_s18 = scalar_lea.hbm %s382_s0, 64 }
   0x5   :  { %p238_p0 = scmp.ne.s32.totalorder %s382_s0, %s237_s18  ;;  %p241_p1 = scmp.lt.u32.totalorder %s237_s18, %s382_s0 }
   0x7   :  { %p243_p2 = pnand %p241_p1, %p238_p0 }
   0x9   :  { %246 = shalt.err (!%p243_p2)
}
   0xa   :  { %s247_s23 = scalar_lea.vmem %s18_s13, 64  ;;  %p252_p4 = scmp.lt.s32.totalorder %s18_s13, %s18_s13 }
   0xb   :  { %p248_p3 = scmp.ne.s32.totalorder %s18_s13, %s247_s23  ;;  %p253_p5 = scmp.lt.s32.totalorder %s247_s23, %s247_s23 }
   0xd   :  { %p254_p6 = por %p253_p5, %p252_p4 }
   0xf   :  { %p255_p7 = pnand %p254_p6, %p248_p3 }
  0x11   :  { %258 = shalt.err (!%p255_p7)
}
  0x12   :  { %20 = dma.hbm_to_vmem [thread:$0]  %s382_s0, 64, %s18_s13, [#allocation3]  }
  0x13   :  { %s259_s28 = scalar_lea.hbm %s383_s1, 1024 }
  0x14   :  { %p260_p8 = scmp.ne.s32.totalorder %s383_s1, %s259_s28  ;;  %p263_p9 = scmp.lt.u32.totalorder %s259_s28, %s383_s1 }
  0x16   :  { %p265_p10 = pnand %p263_p9, %p260_p8 }
  0x18   :  { %268 = shalt.err (!%p265_p10)
}
  0x19   :  { %s269_s6 = scalar_lea.vmem %s336_s15, 1024  ;;  %p274_p12 = scmp.lt.s32.totalorder %s336_s15, %s336_s15 }
  0x1a   :  { %p270_p11 = scmp.ne.s32.totalorder %s336_s15, %s269_s6  ;;  %p275_p13 = scmp.lt.s32.totalorder %s269_s6, %s269_s6 }
  0x1c   :  { %p276_p0 = por %p275_p13, %p274_p12 }
  0x1e   :  { %p277_p1 = pnand %p276_p0, %p270_p11 }
  0x20   :  { %280 = shalt.err (!%p277_p1)
}
  0x21   :  { %s311_s0 = smov 64   ;;  %s312_s7 = smov 4  }
  0x22   :  { %32 = dma.hbm_to_vmem [thread:$0]  %s383_s1, 1024, %s336_s15, [#allocation6], %s311_s0, %s311_s0, %s312_s7  }
  0x23   :  { %303 = dma.done.wait [#allocation3], 64  }
  0x24   :  { %304 = vsyncadd [#allocation3], 4294967232 }
  0x25   :  { %305 = dma.done.wait [#allocation6], 1024  }
  0x26   :  { %306 = vsyncadd [#allocation6], 4294966272  ;;  %v313_v0 = vmov 0.0   ;;  %vm314_vm0 = vmmov 0   ;;  %v229_v1 = vld [vmem:[#allocation5] sm:$0xff]   ;;  %v230_v2 = vld [vmem:[#allocation5 + $0x8] sm:$0xff]  }
  0x27   :  { %202 = vmatprep.subr.bf16.mxu0 %v313_v0  ;;  %218 = vmatprep.mubr.msk.bf16.mxu0 %vm314_vm0, %v313_v0  ;;  %v231_v3 = vld [vmem:[#allocation5 + $0x10] sm:$0xff]   ;;  %v232_v4 = vld [vmem:[#allocation5 + $0x18] sm:$0xff]   ;;  %v233_v5 = vld [vmem:[#allocation5 + $0x20] sm:$0xff]   ;;  %s315_s11 = smov [#allocation7]  }
  0x28   :  { %203 = vmatpush3.bf16.msra.mxu0 %v229_v1  ;;  %v234_v6 = vld [vmem:[#allocation5 + $0x28] sm:$0xff]   ;;  %v235_v7 = vld [vmem:[#allocation5 + $0x30] sm:$0xff]   ;;  %v236_v8 = vld [vmem:[#allocation5 + $0x38] sm:$0xff]   ;;  %s174_s12 = sshll.u32 %s315_s11, 4  ;;  %s175_s12 = int_to_ptr.vmem [resolvable:$true] %s174_s12 }
  0x29   :  { %204 = vmatprep.subr.bf16.mxu0 %v313_v0  ;;  %v48_v9 = vld [vmem:[#allocation2] sm:$0xf]  ;;  %s281_s13 = scalar_lea.vmem %s175_s12, 128  ;;  %p286_p3 = scmp.lt.s32.totalorder %s175_s12, %s175_s12 }
  0x2a   :  { %v192_v11 = vld [vmem:[%s384_s2] ss:$0 sm:$0xff]  ;;  %p282_p2 = scmp.ne.s32.totalorder %s175_s12, %s281_s13  ;;  %p287_p4 = scmp.lt.s32.totalorder %s281_s13, %s281_s13 }
  0x2c   :  { %205 = vmatpush3.bf16.msra.mxu0 %v230_v2  ;;  %p288_p5 = por %p287_p4, %p286_p3 }
  0x2d   :  { %206 = vmatprep.subr.bf16.mxu0 %v313_v0 }
  0x2e   :  { %p289_p6 = pnand %p288_p5, %p282_p2 }
  0x30   :  { %207 = vmatpush3.bf16.msra.mxu0 %v231_v3 }
  0x31   :  { %208 = vmatprep.subr.bf16.mxu0 %v313_v0 }
  0x34   :  { %209 = vmatpush3.bf16.msra.mxu0 %v232_v4 }
  0x35   :  { %210 = vmatprep.subr.bf16.mxu0 %v313_v0 }
  0x38   :  { %211 = vmatpush3.bf16.msra.mxu0 %v233_v5 }
  0x39   :  { %212 = vmatprep.subr.bf16.mxu0 %v313_v0 }
  0x3c   :  { %213 = vmatpush3.bf16.msra.mxu0 %v234_v6 }
  0x3d   :  { %214 = vmatprep.subr.bf16.mxu0 %v313_v0 }
  0x40   :  { %215 = vmatpush3.bf16.msra.mxu0 %v235_v7 }
  0x41   :  { %216 = vmatprep.subr.bf16.mxu0 %v313_v0 }
  0x44   :  { %217 = vmatpush3.bf16.msra.mxu0 %v236_v8 }
  0x47   :  { %219 = vmatmul.mubr.bf16.vlgmr.msra.gmra.mrb[0].mxu0 %v48_v9 }
 0x11a   :  { %v147_v10 = vpop.f32.mrb[0].mxu0 }
 0x11b   :  { %v220_v12 = vpop.f32.mrb[1].mxu0  ;;  %v166_v15 = vadd.f32 %v192_v11, %v147_v10 }
 0x11c   :  { %v150_v13 = vpop.f32.mrb[2].mxu0 }
 0x11d   :  { %v221_v14 = vpop.f32.mrb[3].mxu0  ;;  %167 = vst [vmem:[#allocation7] sm:$0xff] %v166_v15 }
 0x11e   :  { %292 = shalt.err (!%p289_p6)
}
 0x11f   :  { %s293_s16 = scalar_lea.hbm %s385_s3, 128 }
 0x120   :  { %p294_p7 = scmp.ne.s32.totalorder %s385_s3, %s293_s16  ;;  %p297_p8 = scmp.lt.u32.totalorder %s293_s16, %s385_s3 }
 0x122   :  { %p299_p9 = pnand %p297_p8, %p294_p7 }
 0x124   :  { %302 = shalt.err (!%p299_p9)
}
 0x125   :  { %177 = dma.vmem_to_hbm [thread:$0]  %s175_s12, 128, %s385_s3, [#allocation4]  }
 0x126   :  { %307 = dma.done.wait [#allocation4], 128  }
 0x127   :  { %308 = vsyncadd [#allocation4], 4294967168 }
 0x128   :  { %181 = vsyncpa [#allocation3], 1 }
 0x129   :  { %182 = vsyncpa [#allocation6], 1 }
 0x12a   :  { %183 = vsyncpa [#allocation4], 1 }

</bundles_post_ra>
